<compile_context>
chip_gen: v7x
topology: tpu7x:2x2x1
jax: 0.10.0
libtpu: 0.0.40
codegen_flags: <defaults>
</compile_context>

<pallas_src>
import functools

import jax
import jax.numpy as jnp
import numpy as np
from jax.experimental import pallas as pl
from jax.experimental.pallas import tpu as pltpu

MASK = -10.0


def _round_up(x, m):
    return (x + m - 1) // m * m


def _lse_pool_kernel(x_ref, out_ref, m_ref, s_ref, *, inv_temp, temperature,
                     n_total, tn, mask_tail):
    """Online (flash-style) logsumexp over the tiled reduction axis.

    x_ref:   (tm, tn) input tile (k-th slab of the reduction axis)
    out_ref: (tm, 1)  output block, resident across the reduction axis
    m_ref:   (tm, 1)  f32 running max   (VMEM scratch)
    s_ref:   (tm, 1)  f32 running sum   (VMEM scratch)
    """
    k = pl.program_id(1)

    @pl.when(k == 0)
    def _():
        m_ref[...] = jnp.full_like(m_ref, -jnp.inf)
        s_ref[...] = jnp.zeros_like(s_ref)

    x = x_ref[...].astype(jnp.float32)
    invalid = x == MASK                      # reference: sims[sims == -10] = -inf
    if mask_tail:
        # Ragged N: lanes past the array extent hold stale/garbage VMEM -> -inf.
        col = jax.lax.broadcasted_iota(jnp.int32, x.shape, 1) + k * tn
        invalid = invalid | (col >= n_total)
    x = jnp.where(invalid, -jnp.inf, x)

    m_prev = m_ref[...]
    m_new = jnp.maximum(m_prev, jnp.max(x, axis=-1, keepdims=True))
    # Guard fully-masked rows so we never form (-inf) - (-inf).
    m_safe = jnp.where(m_new == -jnp.inf, 0.0, m_new)

    alpha = jnp.exp((m_prev - m_safe) * inv_temp)        # 0 when m_prev == -inf
    p = jnp.exp((x - m_safe) * inv_temp)                 # 0 for masked entries
    # TODO(synk): if a v6e/v7x bundle dump ever shows the single EUP slot binding,
    # the exp above can run in bf16; kept f32 since this kernel is HBM-bound.
    s_ref[...] = alpha * s_ref[...] + jnp.sum(p, axis=-1, keepdims=True)
    m_ref[...] = m_new

    @pl.when(k == pl.num_programs(1) - 1)
    def _():
        m = m_ref[...]
        s = s_ref[...]
        # T * logsumexp(x / T) == m + T * log(sum(exp((x - m) / T)))
        lse = jnp.where(m == -jnp.inf, -jnp.inf, m + temperature * jnp.log(s))
        out_ref[...] = lse.astype(out_ref.dtype)


def _target_block_bytes():
    """Per-generation input-block budget for this HBM-bandwidth-bound kernel."""
    try:
        kind = jax.devices()[0].device_kind.lower()
    except Exception:
        return 4 << 20
    if "v5 lite" in kind or "v5e" in kind or "v5lite" in kind:
        return 4 << 20       # stay friendly to v5e's small scoped-VMEM budget
    return 8 << 20           # v6e / v7x: ~8 MiB blocks amortize ~0.35us/step overhead


def _pick_tiles(rows, cols, itemsize, target_bytes):
    row_align = 8 if itemsize >= 4 else (16 if itemsize == 2 else 32)
    lane = 128
    tn_full = _round_up(cols, lane)
    # Prefer growing the reduction axis first: if N fits in one tile, the online
    # LSE collapses to a single k step.
    tn_cap = max(lane, (target_bytes // (row_align * itemsize)) // lane * lane)
    tn = min(tn_full, tn_cap)
    tm = max(row_align, (target_bytes // (tn * itemsize)) // row_align * row_align)
    tm = min(tm, _round_up(rows, row_align))
    # v7x megacore: keep >= 2 row tiles when possible so both TensorCores get
    # work on the "parallel" axis (harmless on single-core v5e/v6e).
    if rows > row_align and -(-rows // tm) < 2:
        tm = max(row_align, _round_up(-(-rows // 2), row_align))
    return tm, tn


def lse_pooling(sims, temperature=0.1, *, block_rows=None, block_cols=None):
    """Pallas implementation of LSEPooling.forward. sims: (B, M, N) -> (B, M)."""
    assert sims.ndim == 3
    B, M, N = sims.shape
    R = B * M
    x = sims.reshape(R, N)                      # metadata-only relayout, no copy
    itemsize = jnp.dtype(sims.dtype).itemsize

    tm, tn = _pick_tiles(R, N, itemsize, _target_block_bytes())
    if block_rows is not None:
        tm = block_rows
    if block_cols is not None:
        tn = block_cols

    grid = (pl.cdiv(R, tm), pl.cdiv(N, tn))
    mask_tail = (N % tn) != 0

    # NOTE: temperature must be a static Python scalar (matches the nn.Module API).
    kernel = functools.partial(
        _lse_pool_kernel,
        inv_temp=1.0 / float(temperature),
        temperature=float(temperature),
        n_total=N,
        tn=tn,
        mask_tail=mask_tail,
    )

    block_bytes = tm * tn * itemsize
    # Double-buffered input + tiny output/scratch + headroom; capped at 48 MiB so
    # it always fits v7x's 64 MiB/TC physical VMEM (v5e/v6e have 128 MiB).
    vmem_limit = int(min(max(2 * block_bytes + (4 << 20), 24 << 20), 48 << 20))

    out = pl.pallas_call(
        kernel,
        out_shape=jax.ShapeDtypeStruct((R, 1), sims.dtype),
        grid=grid,
        in_specs=[pl.BlockSpec((tm, tn), lambda i, k: (i, k))],
        out_specs=pl.BlockSpec((tm, 1), lambda i, k: (i, 0)),
        scratch_shapes=[
            pltpu.VMEM((tm, 1), jnp.float32),   # running max
            pltpu.VMEM((tm, 1), jnp.float32),   # running sum
        ],
        compiler_params=pltpu.CompilerParams(
            dimension_semantics=("parallel", "arbitrary"),
            vmem_limit_bytes=vmem_limit,
        ),
    )(x)
    return out[:, 0].reshape(B, M)


def _reference(sims, temperature=0.1):
    x = jnp.where(sims == MASK, -jnp.inf, sims.astype(jnp.float32)) / temperature
    return jax.scipy.special.logsumexp(x, axis=-1) * temperature


if __name__ == "__main__":
    key = jax.random.PRNGKey(0)
    k1, k2, k3, k4, k5, k6 = jax.random.split(key, 6)

    # Test 1: small shape, automatic tile selection (single k step, >=2 row tiles).
    B, M, N = 2, 16, 32
    sims = jax.random.normal(k1, (B, M, N), dtype=jnp.float32)
    mask = jax.random.bernoulli(k2, p=0.25, shape=(B, M, N))
    sims = jnp.where(mask, jnp.float32(MASK), sims)
    out = jax.block_until_ready(lse_pooling(sims, temperature=0.1))
    ref = _reference(sims, temperature=0.1)
    np.testing.assert_allclose(np.asarray(out), np.asarray(ref), rtol=1e-5, atol=1e-5)
    assert out.shape == (B, M)

    # Test 2: ragged rows AND columns with small explicit tiles to exercise the
    # multi-step online LSE, the iota tail mask, and partial row/column blocks.
    B2, M2, N2 = 2, 21, 300
    sims2 = jax.random.normal(k3, (B2, M2, N2), dtype=jnp.float32)
    mask2 = jax.random.bernoulli(k4, p=0.25, shape=(B2, M2, N2))
    sims2 = jnp.where(mask2, jnp.float32(MASK), sims2)
    out2 = jax.block_until_ready(
        lse_pooling(sims2, temperature=0.1, block_rows=16, block_cols=128))
    ref2 = _reference(sims2, temperature=0.1)
    np.testing.assert_allclose(np.asarray(out2), np.asarray(ref2), rtol=1e-5, atol=1e-5)
    assert out2.shape == (B2, M2)

    # Test 3: bf16 input path (half the HBM bytes; f32 accumulation in-kernel).
    B3, M3, N3 = 2, 16, 160
    sims3 = jax.random.normal(k5, (B3, M3, N3), dtype=jnp.bfloat16)
    mask3 = jax.random.bernoulli(k6, p=0.25, shape=(B3, M3, N3))
    sims3 = jnp.where(mask3, jnp.bfloat16(MASK), sims3)
    out3 = jax.block_until_ready(lse_pooling(sims3, temperature=0.1))
    ref3 = _reference(sims3, temperature=0.1)
    np.testing.assert_allclose(np.asarray(out3, dtype=np.float32),
                               np.asarray(ref3), rtol=2e-2, atol=5e-2)
    assert out3.shape == (B3, M3)

    print("KERNEL_OK")
</pallas_src>

<mosaic_0001>
module attributes {stable_mosaic.version = 11 : i64} {
  func.func @_lse_pool_kernel(%arg0: i32, %arg1: i32, %arg2: memref<16x128xf32, #tpu.memory_space<vmem>>, %arg3: memref<16x1xf32, #tpu.memory_space<vmem>>, %arg4: memref<16x1xf32, #tpu.memory_space<vmem>>, %arg5: memref<16x1xf32, #tpu.memory_space<vmem>>) attributes {dimension_semantics = [#tpu.dimension_semantics<parallel>, #tpu.dimension_semantics<arbitrary>], iteration_bounds = array<i64: 2, 1>, scalar_prefetch = 0 : i64, scratch_operands = 2 : i64, tpu.core_type = #tpu.core_type<tc>, window_params = [{transform_indices = @transform_0, window_bounds = array<i64: 16, 128>}, {transform_indices = @transform_1, window_bounds = array<i64: 16, 1>}]} {
    %c0_i32 = arith.constant 0 : i32
    %0 = arith.cmpi eq, %arg1, %c0_i32 : i32
    %1 = arith.extui %0 : i1 to i32
    %c0_i32_0 = arith.constant 0 : i32
    %2 = arith.cmpi ne, %1, %c0_i32_0 : i32
    scf.if %2 {
      %cst_19 = arith.constant 0xFF800000 : f32
      %42 = vector.broadcast %cst_19 : f32 to vector<16x1xf32>
      %c0_20 = arith.constant 0 : index
      %c0_21 = arith.constant 0 : index
      %43 = vector.load %arg4[%c0_20, %c0_21] : memref<16x1xf32, #tpu.memory_space<vmem>>, vector<16x1xf32>
      tpu.vector_store %arg4[%c0_20, %c0_21], %42 {strides = array<i32>} : memref<16x1xf32, #tpu.memory_space<vmem>>, vector<16x1xf32>,
      %cst_22 = arith.constant 0.000000e+00 : f32
      %44 = vector.broadcast %cst_22 : f32 to vector<16x1xf32>
      %c0_23 = arith.constant 0 : index
      %c0_24 = arith.constant 0 : index
      %45 = vector.load %arg5[%c0_23, %c0_24] : memref<16x1xf32, #tpu.memory_space<vmem>>, vector<16x1xf32>
      tpu.vector_store %arg5[%c0_23, %c0_24], %44 {strides = array<i32>} : memref<16x1xf32, #tpu.memory_space<vmem>>, vector<16x1xf32>,
    } else {
    }
    %c0 = arith.constant 0 : index
    %c0_1 = arith.constant 0 : index
    %3 = vector.load %arg2[%c0, %c0_1] : memref<16x128xf32, #tpu.memory_space<vmem>>, vector<16x128xf32>
    %cst = arith.constant -1.000000e+01 : f32
    %4 = vector.broadcast %cst : f32 to vector<16x128xf32>
    %5 = arith.cmpf oeq, %3, %4 : vector<16x128xf32>
    %6 = tpu.iota {dimensions = array<i32: 1>} : vector<16x128xi32>
    %c128_i32 = arith.constant 128 : i32
    %7 = arith.muli %arg1, %c128_i32 : i32
    %8 = vector.broadcast %7 : i32 to vector<16x128xi32>
    %9 = arith.addi %6, %8 : vector<16x128xi32>
    %c32_i32 = arith.constant 32 : i32
    %10 = vector.broadcast %c32_i32 : i32 to vector<16x128xi32>
    %11 = arith.cmpi sge, %9, %10 : vector<16x128xi32>
    %12 = arith.ori %5, %11 : vector<16x128xi1>
    %cst_2 = arith.constant 0xFF800000 : f32
    %13 = vector.broadcast %cst_2 : f32 to vector<16x128xf32>
    %14 = arith.select %12, %13, %3 : vector<16x128xi1>, vector<16x128xf32>
    %c0_3 = arith.constant 0 : index
    %c0_4 = arith.constant 0 : index
    %15 = vector.load %arg4[%c0_3, %c0_4] : memref<16x1xf32, #tpu.memory_space<vmem>>, vector<16x1xf32>
    %cst_5 = arith.constant dense<0xFF800000> : vector<16xf32>
    %16 = vector.multi_reduction <maximumf>, %14, %cst_5 [1] : vector<16x128xf32> to vector<16xf32>
    %17 = vector.shape_cast %16 : vector<16xf32> to vector<16x1xf32>
    %18 = arith.maximumf %15, %17 : vector<16x1xf32>
    %cst_6 = arith.constant 0xFF800000 : f32
    %19 = vector.broadcast %cst_6 : f32 to vector<16x1xf32>
    %20 = arith.cmpf oeq, %18, %19 : vector<16x1xf32>
    %cst_7 = arith.constant 0.000000e+00 : f32
    %21 = vector.broadcast %cst_7 : f32 to vector<16x1xf32>
    %22 = arith.select %20, %21, %18 : vector<16x1xi1>, vector<16x1xf32>
    %23 = arith.subf %15, %22 : vector<16x1xf32>
    %cst_8 = arith.constant 1.000000e+01 : f32
    %24 = vector.broadcast %cst_8 : f32 to vector<16x1xf32>
    %25 = arith.mulf %23, %24 : vector<16x1xf32>
    %26 = math.exp %25 : vector<16x1xf32>
    %27 = vector.broadcast %22 : vector<16x1xf32> to vector<16x128xf32>
    %28 = arith.subf %14, %27 : vector<16x128xf32>
    %cst_9 = arith.constant 1.000000e+01 : f32
    %29 = vector.broadcast %cst_9 : f32 to vector<16x128xf32>
    %30 = arith.mulf %28, %29 : vector<16x128xf32>
    %31 = math.exp %30 : vector<16x128xf32>
    %c0_10 = arith.constant 0 : index
    %c0_11 = arith.constant 0 : index
    %32 = vector.load %arg5[%c0_10, %c0_11] : memref<16x1xf32, #tpu.memory_space<vmem>>, vector<16x1xf32>
    %33 = arith.mulf %26, %32 : vector<16x1xf32>
    %cst_12 = arith.constant dense<0.000000e+00> : vector<16xf32>
    %34 = vector.multi_reduction <add>, %31, %cst_12 [1] : vector<16x128xf32> to vector<16xf32>
    %35 = vector.shape_cast %34 : vector<16xf32> to vector<16x1xf32>
    %36 = arith.addf %33, %35 : vector<16x1xf32>
    %c0_13 = arith.constant 0 : index
    %c0_14 = arith.constant 0 : index
    %37 = vector.load %arg5[%c0_13, %c0_14] : memref<16x1xf32, #tpu.memory_space<vmem>>, vector<16x1xf32>
    tpu.vector_store %arg5[%c0_13, %c0_14], %36 {strides = array<i32>} : memref<16x1xf32, #tpu.memory_space<vmem>>, vector<16x1xf32>,
    %c0_15 = arith.constant 0 : index
    %c0_16 = arith.constant 0 : index
    %38 = vector.load %arg4[%c0_15, %c0_16] : memref<16x1xf32, #tpu.memory_space<vmem>>, vector<16x1xf32>
    tpu.vector_store %arg4[%c0_15, %c0_16], %18 {strides = array<i32>} : memref<16x1xf32, #tpu.memory_space<vmem>>, vector<16x1xf32>,
    %c0_i32_17 = arith.constant 0 : i32
    %39 = arith.cmpi eq, %arg1, %c0_i32_17 : i32
    %40 = arith.extui %39 : i1 to i32
    %c0_i32_18 = arith.constant 0 : i32
    %41 = arith.cmpi ne, %40, %c0_i32_18 : i32
    scf.if %41 {
      %c0_19 = arith.constant 0 : index
      %c0_20 = arith.constant 0 : index
      %42 = vector.load %arg4[%c0_19, %c0_20] : memref<16x1xf32, #tpu.memory_space<vmem>>, vector<16x1xf32>
      %c0_21 = arith.constant 0 : index
      %c0_22 = arith.constant 0 : index
      %43 = vector.load %arg5[%c0_21, %c0_22] : memref<16x1xf32, #tpu.memory_space<vmem>>, vector<16x1xf32>
      %cst_23 = arith.constant 0xFF800000 : f32
      %44 = vector.broadcast %cst_23 : f32 to vector<16x1xf32>
      %45 = arith.cmpf oeq, %42, %44 : vector<16x1xf32>
      %46 = math.log %43 : vector<16x1xf32>
      %cst_24 = arith.constant 1.000000e-01 : f32
      %47 = vector.broadcast %cst_24 : f32 to vector<16x1xf32>
      %48 = arith.mulf %47, %46 : vector<16x1xf32>
      %49 = arith.addf %42, %48 : vector<16x1xf32>
      %cst_25 = arith.constant 0xFF800000 : f32
      %50 = vector.broadcast %cst_25 : f32 to vector<16x1xf32>
      %51 = arith.select %45, %50, %49 : vector<16x1xi1>, vector<16x1xf32>
      %c0_26 = arith.constant 0 : index
      %c0_27 = arith.constant 0 : index
      %52 = vector.load %arg3[%c0_26, %c0_27] : memref<16x1xf32, #tpu.memory_space<vmem>>, vector<16x1xf32>
      tpu.vector_store %arg3[%c0_26, %c0_27], %51 {strides = array<i32>} : memref<16x1xf32, #tpu.memory_space<vmem>>, vector<16x1xf32>,
    } else {
    }
    return
  }
  func.func @transform_0(%arg0: i32, %arg1: i32) -> (i32, i32) {
    %c0_i32 = arith.constant 0 : i32
    return %arg0, %arg1 : i32, i32
  }
  func.func @transform_1(%arg0: i32, %arg1: i32) -> (i32, i32) {
    %c0_i32 = arith.constant 0 : i32
    %c0_i32_0 = arith.constant 0 : i32
    return %arg0, %c0_i32 : i32, i32
  }
}

</mosaic_0001>

<bundles_post_ra>
// kernel: tpu_custom_call.1
= control target key start
LH: loop header
LB: loop body
LE: loop exit
PB: predicated region body
PF: predicated region fallthrough
CT: control target
= control target key end

     0   :  { %6 = vsyncpa [#allocation5], 0  ;;  %s648_s0 = inlined_call_operand.hbm [shape: f32[32,32], index: 0, kind: input, shape index: {}]   ;;  %s649_s1 = inlined_call_operand.vmem [shape: f32[32,1], index: 1, kind: output, shape index: {}]  }
   0x1   :  { %8 = vsyncpa [#allocation5 + $0x1], 0  ;;  %s515_s6 = smov 0   ;;  %s517_s7 = smov 0  }
   0x2   :  { %s519_s8 = smov 0   ;;  %s521_s9 = smov 0  }
   0x3   :  { %s523_s10 = smov 0   ;;  %s525_s11 = smov 0  }
   0x4 LB: > { %s329_s12 = sadd.s32 4294967295, %s497_s11   ;;  %s26_s13 = sadd.s32 1, %s493_s10  ;;  %s497_s11 = sphi %s525_s11, %s14_s11   ;;  %s493_s10 = sphi %s523_s10, %s657_s10   ;;  %s489_s9 = sphi %s521_s9, %s656_s9   ;;  %s485_s8 = sphi %s519_s8, %s655_s8   ;;  %s481_s7 = sphi %s517_s7, %s654_s7   ;;  %s477_s6 = sphi %s515_s6, %s653_s6  }
   0x5   : > { %p28_p0 = scmp.ge.s32.totalorder %s26_s13, 2  ;;  %s35_s14 = sadd.s32 1, %s485_s8 }
   0x6   : > { %p42_p1 = scmp.ne.s32.totalorder %s485_s8, %s481_s7  ;;  %p43_p2 = scmp.eq.s32.totalorder %s497_s11, 0 }
   0x7   : > { %s659_s13 = smov (%p28_p0, %s26_s13), 0  ;;  %p48_p4 = scmp.ne.s32.totalorder %s481_s7, %s477_s6 }
   0x8   : > { %p551_p3 = por %p43_p2, %p42_p1  ;;  %s30_s16 = ssub.s32 %s493_s10, %s659_s13 }
   0x9   : > { %p49_p5 = scmp.eq.s32.totalorder %s329_s12, 0  ;;  %p33_p6 = scmp.eq.s32.totalorder %s30_s16, 0 }
   0xa   : > { %p349_p8 = scmp.lt.s32.totalorder %s497_s11, 2  ;;  %s98_s19 = sand.u32 1, %s485_s8  }
   0xb   : > { %p558_p7 = por %p49_p5, %p48_p4  ;;  %s342_s20 = sshll.u32 %s493_s10, 8 }
   0xc   : > { %s564_s18 = scalar_select %p33_p6, %s485_s8, %s35_s14  }
   0xd   : > { %s333_s21 = sshll.u32 %s98_s19, 4  ;;  %s571_s24 = scalar_lea.hbm %s648_s0, %s342_s20 }
   0xe   : > { %s102_s25 = scalar_lea.vmem [#allocation4], %s333_s21  ;;  %p575_p9 = pnand %p349_p8, %p551_p3 }
   0xf   : > { %s110_s26 = sshll.u32 %s102_s25, 4  ;;  %s581_s28 = scalar_lea.sflag [#allocation5], %s98_s19  ;;  %s579_s26 = int_to_ptr.vmem [resolvable:$true] %s110_s26 }
  0x10   : > { %s417_s29 = scalar_lea.hbm %s571_s24, 256  ;;  %p419_p11 = pneg %p575_p9 }
  0x11   : > { %p418_p10 = scmp.ne.s32.totalorder %s571_s24, %s417_s29  ;;  %s422_s3 = scalar_lea.hbm %s648_s0, 512 }
  0x12   : > { %p423_p0 = scmp.lt.u32.totalorder %s571_s24, %s648_s0  ;;  %p424_p1 = scmp.lt.u32.totalorder %s422_s3, %s417_s29 }
  0x13   : > { %p420_p12 = pnand %p419_p11, %p418_p10  ;;  %p426_p3 = scmp.lt.u32.totalorder %s417_s29, %s571_s24 }
  0x14   : > { %p425_p2 = por %p424_p1, %p423_p0 }
  0x15   : > { %p421_p13 = pneg %p420_p12 }
  0x16   : > { %p427_p4 = por %p426_p3, %p425_p2 }
  0x18   : > { %p428_p5 = pnand %p427_p4, %p421_p13 }
  0x1a   : > { %431 = shalt.err (!%p428_p5)
}
  0x1b   : > { %s432_s6 = scalar_lea.vmem %s579_s26, 256  ;;  %s499_s12 = smov [#allocation4]  }
  0x1c   : > { %p433_p6 = scmp.ne.s32.totalorder %s579_s26, %s432_s6  ;;  %s437_s14 = sshll.u32 %s499_s12, 4  ;;  %s438_s14 = int_to_ptr.vmem [resolvable:$false] %s437_s14 }
  0x1d   : > { %s439_s15 = scalar_lea.vmem %s438_s14, 512  ;;  %p440_p12 = scmp.lt.s32.totalorder %s579_s26, %s438_s14 }
  0x1e   : > { %p435_p8 = pnand %p433_p6, %p419_p11  ;;  %p441_p0 = scmp.lt.s32.totalorder %s439_s15, %s432_s6 }
  0x20   : > { %p436_p10 = pneg %p435_p8  ;;  %p442_p1 = por %p441_p0, %p440_p12 }
  0x22   : > { %p443_p2 = pnand %p442_p1, %p436_p10 }
  0x24   : > { %446 = shalt.err (!%p443_p2)
}
  0x25   : > { %s500_s16 = smov 128   ;;  %s501_s19 = smov 8  }
  0x26   : > { %348 = dma.hbm_to_vmem [thread:$0]  (!%p575_p9), %s571_s24, 256, %s579_s26, %s581_s28, %s500_s16, %s500_s16, %s501_s19  }
  0x27   : > { %p336_p11 = scmp.ge.s32.totalorder %s497_s11, 1  ;;  %p118_p13 = scmp.lt.s32.totalorder %s497_s11, 3 }
  0x29   : > { %p119_p3 = pnand %p336_p11, %p118_p13 }
  0x2a   : > { %s124_s20 = sand.u32 (!%p119_p3), 1, %s481_s7  }
  0x2b   : > { %122 = sbr.rel (%p119_p3) target bundleno = 524 (0x20c), region = 24  ;;  %s337_s21 = sshll.u32 (!%p119_p3), %s124_s20, 4 }
  0x2c   : > { %s125_s22 = scalar_lea.sflag (!%p119_p3), [#allocation5], %s124_s20  ;;  %s128_s23 = scalar_lea.vmem (!%p119_p3), [#allocation4], %s337_s21 }
  0x32   : > { %472 = dma.done.wait (%p558_p7), %s125_s22, 256  }
  0x33   : > { %474 = vsyncadd (%p558_p7), %s125_s22, 4294967040  ;;  %v167_v0 = vlaneseq  ;;  %vm158_vm0 = vcmask 7168   ;;  %v502_v1 = vmov -inf   ;;  %v163_v3 = vld [vmem:[%s128_s23] sm:$0xff]  ;;  %v164_v4 = vld [vmem:[%s128_s23 + $0x8] sm:$0xff]  ;;  %v503_v7 = vmov 0  }
  0x34   : > { %159 = vst.msk [vmem:[#allocation2] sm:$0xff] %vm158_vm0, %v502_v1  ;;  %160 = vst.msk [vmem:[#allocation2 + $0x8] sm:$0xff] %vm158_vm0, %v502_v1  ;;  %vm165_vm2 = vcmp.eq.f32.partialorder %v163_v3, -10.0  ;;  %vm166_vm3 = vcmp.eq.f32.partialorder %v164_v4, -10.0  ;;  %403 = vset.pattern.permute.xlu1 %v503_v7  ;;  %404 = vset.pattern.permute.xlu0 %v503_v7  ;;  %v504_v8 = vmov 0.0   ;;  %s338_s17 = sshll.u32 %s489_s9, 1 }
  0x35   : > { %v168_v2 = vand.u32 127, %v167_v0  ;;  %161 = vst.msk [vmem:[#allocation3] sm:$0xff] %vm158_vm0, %v504_v8  ;;  %162 = vst.msk [vmem:[#allocation3 + $0x8] sm:$0xff] %vm158_vm0, %v504_v8  ;;  %p149_p7 = scmp.lt.s32.totalorder %s338_s17, 3 }
  0x37   : > { %vm172_vm1 = vcmp.ge.s32.totalorder %v168_v2, 32  ;;  %s661_s17 = smov (!%p149_p7, %s338_s17), 3 }
  0x38   : > { %vm173_vm4 = vmor %vm165_vm2, %vm172_vm1  ;;  %s339_s24 = sshll.u32 %s661_s17, 3 }
  0x39   : > { %v175_v5 = vsel %vm173_vm4, -inf, %v163_v3  ;;  %vm174_vm5 = vmor %vm166_vm3, %vm172_vm1  ;;  %s152_s27 = scalar_lea.vmem %s649_s1, %s339_s24 }
  0x3a   : > { %179 = vmax.xlane.f32.xlu0 %v175_v5  ;;  %v176_v6 = vsel %vm174_vm5, -inf, %v164_v4 }
  0x3b   : > { %v177_v9 = vld [vmem:[#allocation2] sm:$0xff]  ;;  %v178_v12 = vld [vmem:[#allocation2 + $0x8] sm:$0xff] }
  0x3c   : > { %v215_v34 = vld [vmem:[#allocation3] sm:$0xff]  ;;  %v216_v38 = vld [vmem:[#allocation3 + $0x8] sm:$0xff] }
  0x3e   : > { %181 = vmax.xlane.f32.xlu0 %v176_v6 }
  0xc7   : > { %v180_v10 = vpop.xlane.xlu0 %179 }
  0xc8   : > { %v183_v11 = vmax.f32 %v177_v9, %v180_v10 }
  0xca   : > { %228 = vst.msk [vmem:[#allocation2] sm:$0xff] %vm158_vm0, %v183_v11  ;;  %vm185_vm6 = vcmp.eq.f32.partialorder %v183_v11, -inf }
  0xcb   : > { %v182_v13 = vpop.xlane.xlu0 %181  ;;  %v187_v14 = vsel %vm185_vm6, 0.0, %v183_v11 }
  0xcc   : > { %v184_v15 = vmax.f32 %v178_v12, %v182_v13  ;;  %199 = vperm.xlu1 %403, %v187_v14   ;;  %v189_v16 = vsub.f32 %v177_v9, %v187_v14 }
  0xce   : > { %229 = vst.msk [vmem:[#allocation2 + $0x8] sm:$0xff] %vm158_vm0, %v184_v15  ;;  %vm186_vm7 = vcmp.eq.f32.partialorder %v184_v15, -inf  ;;  %v191_v29 = vmul.f32 10.0, %v189_v16 }
  0xcf   : > { %v188_v17 = vsel %vm186_vm7, 0.0, %v184_v15 }
  0xd0   : > { %v190_v18 = vsub.f32 %v178_v12, %v188_v17  ;;  %204 = vperm.xlu1 %403, %v188_v17   ;;  %v193_v30 = vmul.f32 1.442695, %v191_v29 }
  0xd1   : > { %v233_v47 = vld [vmem:[#allocation2] sm:$0xff] }
  0xd2   : > { %v192_v31 = vmul.f32 10.0, %v190_v18  ;;  %vm237_vm8 = vcmp.eq.f32.partialorder %v233_v47, -inf }
  0xd4   : > { %v195_v32 = vmul.f32 1.442695, %v192_v31 }
  0xd5   : > { %v234_v52 = vld [vmem:[#allocation2 + $0x8] sm:$0xff] }
  0xd6   : > { %vm238_vm9 = vcmp.eq.f32.partialorder %v234_v52, -inf }
 0x14b   : > { %v200_v19 = vpop.permute.xlu1 %199 }
 0x14c   : > { %v207_v20 = vsub.f32 %v175_v5, %v200_v19 }
 0x14e   : > { %v209_v21 = vmul.f32 10.0, %v207_v20 }
 0x14f   : > { %v205_v22 = vpop.permute.xlu1 %204 }
 0x150   : > { %v211_v23 = vmul.f32 1.442695, %v209_v21  ;;  %v208_v24 = vsub.f32 %v176_v6, %v205_v22 }
 0x152   : > { %405 = vpow2.f32 %v211_v23  ;;  %v210_v25 = vmul.f32 10.0, %v208_v24 }
 0x154   : > { %v213_v26 = vmul.f32 1.442695, %v210_v25 }
 0x156   : > { %407 = vpow2.f32 %v213_v26 }
 0x157   : > { %409 = vpow2.f32 %v193_v30 }
 0x158   : > { %411 = vpow2.f32 %v195_v32 }
 0x15c   : > { %v406_v27 = vpop.eup %405 }
 0x15d   : > { %219 = vadd.xlane.f32.xlu0 %v406_v27 }
 0x160   : > { %v408_v28 = vpop.eup %407 }
 0x161   : > { %221 = vadd.xlane.f32.xlu1 %v408_v28  ;;  %v410_v33 = vpop.eup %409 }
 0x162   : > { %v217_v35 = vmul.f32 %v410_v33, %v215_v34  ;;  %v412_v36 = vpop.eup %411 }
 0x163   : > { %v218_v40 = vmul.f32 %v412_v36, %v216_v38 }
 0x1ea   : > { %v220_v37 = vpop.xlane.xlu0 %219 }
 0x1eb   : > { %v223_v39 = vadd.f32 %v220_v37, %v217_v35 }
 0x1ed   : > { %226 = vst.msk [vmem:[#allocation3] sm:$0xff] %vm158_vm0, %v223_v39 }
 0x1ee   : > { %v222_v41 = vpop.xlane.xlu1 %221 }
 0x1ef   : > { %v224_v42 = vadd.f32 %v222_v41, %v218_v40 }
 0x1f1   : > { %227 = vst.msk [vmem:[#allocation3 + $0x8] sm:$0xff] %vm158_vm0, %v224_v42 }
 0x1f4   : > { %v235_v43 = vld [vmem:[#allocation3] sm:$0xff] }
 0x1f5   : > { %413 = vlog2.f32 %v235_v43 }
 0x1f8   : > { %v236_v44 = vld [vmem:[#allocation3 + $0x8] sm:$0xff] }
 0x1f9   : > { %415 = vlog2.f32 %v236_v44 }
 0x1ff   : > { %v414_v45 = vpop.eup %413 }
 0x200   : > { %v240_v46 = vmul.f32 0.6931472, %v414_v45 }
 0x202   : > { %v243_v48 = vmul.f32 0.1, %v240_v46 }
 0x203   : > { %v416_v49 = vpop.eup %415 }
 0x204   : > { %v245_v50 = vadd.f32 %v243_v48, %v233_v47  ;;  %v242_v51 = vmul.f32 0.6931472, %v416_v49 }
 0x206   : > { %v247_v53 = vsel %vm237_vm8, -inf, %v245_v50  ;;  %v244_v54 = vmul.f32 0.1, %v242_v51 }
 0x207   : > { %249 = vst.msk [vmem:[%s152_s27] sm:$0xff] %vm158_vm0, %v247_v53 }
 0x208   : > { %v246_v55 = vadd.f32 %v244_v54, %v234_v52 }
 0x20a   : > { %v248_v56 = vsel %vm238_vm9, -inf, %v246_v55 }
 0x20b   : > { %250 = vst.msk [vmem:[%s152_s27 + $0x8] sm:$0xff] %vm158_vm0, %v248_v56 }
 0x20c PF: > { %s14_s11 = sadd.s32 1, %s497_s11   ;;  %s653_s6 = smov %s481_s7 }
 0x20d   : > { %p11_p9 = scmp.ge.s32.totalorder %s14_s11, 4   ;;  %s654_s7 = smov %s485_s8 }
 0x20e   : > { %s655_s8 = smov %s564_s18  ;;  %s656_s9 = smov %s493_s10 }
 0x20f   : > { %s657_s10 = smov %s659_s13  ;;  %13 = sbr.rel (!%p11_p9) target bundleno = 4 (0x4), region = 72 }
 0x216   :  { %273 = vsyncpa [#allocation5], 1 }
 0x217   :  { %275 = vsyncpa [#allocation5 + $0x1], 1 }

</bundles_post_ra>
